<compile_context>
chip_gen: v7x
topology: tpu7x:2x2x1
jax: 0.10.0
libtpu: 0.0.40
codegen_flags: <defaults>
</compile_context>

<pallas_src>
import functools

import jax
import jax.numpy as jnp
from jax.experimental import pallas as pl
from jax.experimental.pallas import tpu as pltpu


def mlp_logits_kernel(gol_ref, gen_ref, w_ref, out_ref):
    """out = [gol | gen | |gol-gen|] @ W.T as three MXU dots, summed once."""
    gol = gol_ref[...]                                   # (bm, D)
    gen = gen_ref[...]                                   # (bm, D)
    D = gol.shape[1]

    # Contract last dims: (bm, D) x (C, D) -> (bm, C).  Static lane-aligned
    # slices of the resident (C, 3D) weight tile; no (bm, 3D) concat is ever
    # materialized.
    dn = (((1,), (1,)), ((), ()))
    out_ref[...] = (
        jax.lax.dot_general(gol, w_ref[:, 0:D], dn,
                            preferred_element_type=jnp.float32)
        + jax.lax.dot_general(gen, w_ref[:, D:2 * D], dn,
                              preferred_element_type=jnp.float32)
        + jax.lax.dot_general(jnp.abs(gol - gen), w_ref[:, 2 * D:3 * D], dn,
                              preferred_element_type=jnp.float32)
    )


def _round_up(x, m):
    return ((x + m - 1) // m) * m


def _physical_vmem_bytes():
    try:
        return int(pltpu.get_tpu_info().vmem_capacity_bytes)
    except Exception:
        return 64 << 20           # v7x per-TC floor; conservative elsewhere


def _pick_tiling(B, D, C, in_itemsize):
    """Pick batch tile rows + an explicit VMEM limit for CompilerParams."""
    phys = _physical_vmem_bytes()

    # Per-row double-buffered footprint: 2 embedding inputs x 2 pipeline
    # buffers + f32 output lane-padded to 128, double-buffered.
    per_row = 2 * 2 * D * in_itemsize + 2 * max(C, 128) * 4

    # Cap sized against the smallest-VMEM generation (v7x 64 MiB physical):
    # bf16 -> 4096 rows (~28 MiB), f32 -> 2048 rows (~26 MiB).
    cap = 4096 if in_itemsize <= 2 else 2048
    while cap > 64 and cap * per_row > phys - (8 << 20):
        cap //= 2

    bm = cap
    if B > 32:
        # Guarantee >=4 grid steps so dimension_semantics=("parallel",) can
        # shard the batch across both v7x TensorCores.
        bm = min(bm, _round_up(pl.cdiv(B, 4), 8))
    if bm >= B:
        bm = B                    # single full-batch block (any B is legal)
    else:
        bm = _round_up(bm, 8)     # (8, 128) block-shape constraint

    w_bytes = 2 * _round_up(C, 8) * 3 * D * in_itemsize
    vmem_limit = int(1.25 * (bm * per_row + w_bytes)) + (4 << 20)
    vmem_limit = max(vmem_limit, 4 << 20)
    vmem_limit = min(vmem_limit, phys - (4 << 20))
    return bm, vmem_limit


@functools.partial(jax.jit, static_argnames=("strict_parity",))
def mlp_forward(emb_gol, emb_gen, labels, weight, bias, strict_parity=False):
    """weight: (2, 3*768) in PyTorch convention (NOT transposed); bias: (2,).

    Default path casts embeddings/weight to bf16 (kernel is HBM-bound; half
    the bytes ~= half the wall clock); accumulation stays f32 on the MXU.
    strict_parity=True keeps f32 inputs for bit-closer PyTorch parity.
    """
    B, D = emb_gol.shape
    C = weight.shape[0]

    in_dtype = jnp.float32 if strict_parity else jnp.bfloat16
    emb_gol = emb_gol.astype(in_dtype)
    emb_gen = emb_gen.astype(in_dtype)
    weight = weight.astype(in_dtype)
    # TODO(synk): optional fp8 embedding path on v7x (quarters HBM bytes) if
    # the |gol-gen| feature tolerates the quantization.

    bm, vmem_limit = _pick_tiling(B, D, C, jnp.dtype(in_dtype).itemsize)

    raw_logits = pl.pallas_call(
        mlp_logits_kernel,
        out_shape=jax.ShapeDtypeStruct((B, C), jnp.float32),
        grid=(pl.cdiv(B, bm),),                       # ragged last block is fine
        in_specs=[
            # If profiling ever shows HBM idle gaps at step boundaries, add
            # pipeline_mode=pl.Buffered(3) to these two specs (re-check VMEM).
            pl.BlockSpec((bm, D), lambda i: (i, 0)),
            pl.BlockSpec((bm, D), lambda i: (i, 0)),
            pl.BlockSpec((C, 3 * D), lambda i: (0, 0)),   # lane-dense, resident
        ],
        out_specs=pl.BlockSpec((bm, C), lambda i: (i, 0)),
        compiler_params=pltpu.CompilerParams(
            dimension_semantics=("parallel",),
            vmem_limit_bytes=vmem_limit),
    )(emb_gol, emb_gen, weight)

    # Bias + cross-entropy epilogue on the tiny (B, 2) logits; fused by jit,
    # keeps lane-sparse bias/label operands and iota/one-hot out of the kernel.
    logits = raw_logits + bias.astype(jnp.float32)[None, :]
    m = jnp.max(logits, axis=1, keepdims=True)
    lse = (m + jnp.log(jnp.sum(jnp.exp(logits - m), axis=1, keepdims=True)))[:, 0]
    picked = jnp.take_along_axis(
        logits, labels.astype(jnp.int32)[:, None], axis=1)[:, 0]
    loss = jnp.mean(lse - picked)             # CrossEntropyLoss, mean reduction
    return loss, logits


if __name__ == "__main__":
    B, D, C = 8, 768, 2

    key = jax.random.PRNGKey(0)
    k_gol, k_gen, k_lbl, k_w, k_b = jax.random.split(key, 5)

    emb_gol = jax.random.normal(k_gol, (B, D), dtype=jnp.float32)
    emb_gen = jax.random.normal(k_gen, (B, D), dtype=jnp.float32)
    labels = jax.random.randint(k_lbl, (B,), 0, C, dtype=jnp.int32)

    # nn.Linear(3*768, 2) default init: U(-1/sqrt(fan_in), 1/sqrt(fan_in))
    bound = 1.0 / jnp.sqrt(3.0 * D)
    weight = jax.random.uniform(k_w, (C, 3 * D), minval=-bound, maxval=bound,
                                dtype=jnp.float32)
    bias = jax.random.uniform(k_b, (C,), minval=-bound, maxval=bound,
                              dtype=jnp.float32)

    # Pure-JAX reference (PyTorch semantics).
    feats = jnp.concatenate([emb_gol, emb_gen, jnp.abs(emb_gol - emb_gen)], axis=1)
    logits_ref = feats @ weight.T + bias
    lse_ref = jax.scipy.special.logsumexp(logits_ref, axis=1)
    loss_ref = jnp.mean(lse_ref - logits_ref[jnp.arange(B), labels])

    # --- strict-parity f32 path ---
    loss32, logits32 = mlp_forward(emb_gol, emb_gen, labels, weight, bias,
                                   strict_parity=True)
    jax.block_until_ready((loss32, logits32))
    assert jnp.allclose(logits32, logits_ref, atol=1e-4), "f32 logits mismatch"
    assert jnp.allclose(loss32, loss_ref, atol=1e-5), "f32 loss mismatch"

    # --- default bf16 path (halved DMA bytes; f32 MXU accumulation) ---
    loss_bf, logits_bf = mlp_forward(emb_gol, emb_gen, labels, weight, bias)
    jax.block_until_ready((loss_bf, logits_bf))
    assert jnp.allclose(logits_bf, logits_ref, atol=5e-2), "bf16 logits mismatch"
    assert jnp.allclose(loss_bf, loss_ref, atol=5e-2), "bf16 loss mismatch"

    print("KERNEL_OK")
</pallas_src>

<mosaic_0001>
module attributes {stable_mosaic.version = 11 : i64} {
  func.func @mlp_logits_kernel(%arg0: i32, %arg1: memref<8x768xf32, #tpu.memory_space<vmem>>, %arg2: memref<8x768xf32, #tpu.memory_space<vmem>>, %arg3: memref<2x2304xf32, #tpu.memory_space<vmem>>, %arg4: memref<8x2xf32, #tpu.memory_space<vmem>>) attributes {dimension_semantics = [#tpu.dimension_semantics<parallel>], iteration_bounds = array<i64: 1>, scalar_prefetch = 0 : i64, scratch_operands = 0 : i64, tpu.core_type = #tpu.core_type<tc>, window_params = [{transform_indices = @transform_0, window_bounds = array<i64: 8, 768>}, {transform_indices = @transform_1, window_bounds = array<i64: 8, 768>}, {pipeline_mode = #tpu.pipeline_mode<synchronous>, transform_indices = @transform_2, window_bounds = array<i64: 2, 2304>}, {transform_indices = @transform_3, window_bounds = array<i64: 8, 2>}]} {
    %c0 = arith.constant 0 : index
    %c0_0 = arith.constant 0 : index
    %0 = vector.load %arg1[%c0, %c0_0] : memref<8x768xf32, #tpu.memory_space<vmem>>, vector<8x768xf32>
    %c0_1 = arith.constant 0 : index
    %c0_2 = arith.constant 0 : index
    %1 = vector.load %arg2[%c0_1, %c0_2] : memref<8x768xf32, #tpu.memory_space<vmem>>, vector<8x768xf32>
    %c0_3 = arith.constant 0 : index
    %c0_4 = arith.constant 0 : index
    %2 = vector.load %arg3[%c0_3, %c0_4] : memref<2x2304xf32, #tpu.memory_space<vmem>>, vector<2x768xf32>
    %cst = arith.constant dense<0.000000e+00> : vector<8x2xf32>
    %3 = tpu.matmul %0, %2, %cst {dimension_numbers = #tpu.dot_dimension_numbers<[1], [1], [0], [0], [0, 0, 1, 0], [], []>} : vector<8x768xf32>, vector<2x768xf32>, vector<8x2xf32> -> vector<8x2xf32>
    %c0_5 = arith.constant 0 : index
    %c768 = arith.constant 768 : index
    %4 = vector.load %arg3[%c0_5, %c768] : memref<2x2304xf32, #tpu.memory_space<vmem>>, vector<2x768xf32>
    %cst_6 = arith.constant dense<0.000000e+00> : vector<8x2xf32>
    %5 = tpu.matmul %1, %4, %cst_6 {dimension_numbers = #tpu.dot_dimension_numbers<[1], [1], [0], [0], [0, 0, 1, 0], [], []>} : vector<8x768xf32>, vector<2x768xf32>, vector<8x2xf32> -> vector<8x2xf32>
    %6 = arith.addf %3, %5 : vector<8x2xf32>
    %7 = arith.subf %0, %1 : vector<8x768xf32>
    %8 = math.absf %7 : vector<8x768xf32>
    %c0_7 = arith.constant 0 : index
    %c1536 = arith.constant 1536 : index
    %9 = vector.load %arg3[%c0_7, %c1536] : memref<2x2304xf32, #tpu.memory_space<vmem>>, vector<2x768xf32>
    %cst_8 = arith.constant dense<0.000000e+00> : vector<8x2xf32>
    %10 = tpu.matmul %8, %9, %cst_8 {dimension_numbers = #tpu.dot_dimension_numbers<[1], [1], [0], [0], [0, 0, 1, 0], [], []>} : vector<8x768xf32>, vector<2x768xf32>, vector<8x2xf32> -> vector<8x2xf32>
    %11 = arith.addf %6, %10 : vector<8x2xf32>
    %c0_9 = arith.constant 0 : index
    %c0_10 = arith.constant 0 : index
    %12 = vector.load %arg4[%c0_9, %c0_10] : memref<8x2xf32, #tpu.memory_space<vmem>>, vector<8x2xf32>
    tpu.vector_store %arg4[%c0_9, %c0_10], %11 {strides = array<i32>} : memref<8x2xf32, #tpu.memory_space<vmem>>, vector<8x2xf32>,
    return
  }
  func.func @transform_0(%arg0: i32) -> (i32, i32) {
    %c0_i32 = arith.constant 0 : i32
    %c0_i32_0 = arith.constant 0 : i32
    return %arg0, %c0_i32 : i32, i32
  }
  func.func @transform_1(%arg0: i32) -> (i32, i32) {
    %c0_i32 = arith.constant 0 : i32
    %c0_i32_0 = arith.constant 0 : i32
    return %arg0, %c0_i32 : i32, i32
  }
  func.func @transform_2(%arg0: i32) -> (i32, i32) {
    %c0_i32 = arith.constant 0 : i32
    %c0_i32_0 = arith.constant 0 : i32
    %c0_i32_1 = arith.constant 0 : i32
    return %c0_i32, %c0_i32_0 : i32, i32
  }
  func.func @transform_3(%arg0: i32) -> (i32, i32) {
    %c0_i32 = arith.constant 0 : i32
    %c0_i32_0 = arith.constant 0 : i32
    return %arg0, %c0_i32 : i32, i32
  }
}

</mosaic_0001>

<bundles_post_ra>
// kernel: mlp_forward.1
= control target key start
LH: loop header
LB: loop body
LE: loop exit
PB: predicated region body
PF: predicated region fallthrough
CT: control target
= control target key end

     0   :  { %8 = vsyncpa [#allocation3], 0  ;;  %s975_s0 = inlined_call_operand.hbm [shape: f32[8,768], index: 0, kind: input, shape index: {}]   ;;  %s976_s1 = inlined_call_operand.hbm [shape: f32[8,768], index: 1, kind: input, shape index: {}]   ;;  %s977_s2 = inlined_call_operand.hbm [shape: f32[2,2304], index: 2, kind: input, shape index: {}]   ;;  %s978_s3 = inlined_call_operand.vmem [shape: f32[8,2], index: 3, kind: output, shape index: {}]  }
   0x1   :  { %9 = vsyncpa [#allocation5], 0  ;;  %s912_s12 = smov [#allocation4]   ;;  %s913_s14 = smov [#allocation2]  }
   0x2   :  { %s26_s13 = sshll.u32 %s912_s12, 4  ;;  %s16_s15 = sshll.u32 %s913_s14, 4  ;;  %s27_s13 = int_to_ptr.vmem [resolvable:$true] %s26_s13  ;;  %s17_s15 = int_to_ptr.vmem [resolvable:$true] %s16_s15 }
   0x3   :  { %s842_s18 = scalar_lea.hbm %s976_s1, 768 }
   0x4   :  { %p843_p0 = scmp.ne.s32.totalorder %s976_s1, %s842_s18  ;;  %p846_p1 = scmp.lt.u32.totalorder %s842_s18, %s976_s1 }
   0x6   :  { %p848_p2 = pnand %p846_p1, %p843_p0 }
   0x8   :  { %851 = shalt.err (!%p848_p2)
}
   0x9   :  { %s852_s23 = scalar_lea.vmem %s27_s13, 768  ;;  %p857_p4 = scmp.lt.s32.totalorder %s27_s13, %s27_s13 }
   0xa   :  { %p853_p3 = scmp.ne.s32.totalorder %s27_s13, %s852_s23  ;;  %p858_p5 = scmp.lt.s32.totalorder %s852_s23, %s852_s23 }
   0xc   :  { %p859_p6 = por %p858_p5, %p857_p4 }
   0xe   :  { %p860_p7 = pnand %p859_p6, %p853_p3 }
  0x10   :  { %863 = shalt.err (!%p860_p7)
}
  0x11   :  { %29 = dma.hbm_to_vmem [thread:$0]  %s976_s1, 768, %s27_s13, [#allocation5]  }
  0x12   :  { %s864_s28 = scalar_lea.hbm %s975_s0, 768 }
  0x13   :  { %p865_p8 = scmp.ne.s32.totalorder %s975_s0, %s864_s28  ;;  %p868_p9 = scmp.lt.u32.totalorder %s864_s28, %s975_s0 }
  0x15   :  { %p870_p10 = pnand %p868_p9, %p865_p8 }
  0x17   :  { %873 = shalt.err (!%p870_p10)
}
  0x18   :  { %s874_s6 = scalar_lea.vmem %s17_s15, 768  ;;  %p879_p12 = scmp.lt.s32.totalorder %s17_s15, %s17_s15 }
  0x19   :  { %p875_p11 = scmp.ne.s32.totalorder %s17_s15, %s874_s6  ;;  %p880_p13 = scmp.lt.s32.totalorder %s874_s6, %s874_s6 }
  0x1b   :  { %p881_p0 = por %p880_p13, %p879_p12 }
  0x1d   :  { %p882_p1 = pnand %p881_p0, %p875_p11 }
  0x1f   :  { %885 = shalt.err (!%p882_p1)
}
  0x20   :  { %19 = dma.hbm_to_vmem [thread:$0]  %s975_s0, 768, %s17_s15, [#allocation3]  }
  0x21   :  { %s914_s8 = smov [#allocation6]   ;;  %s886_s12 = scalar_lea.hbm %s977_s2, 576 }
  0x22   :  { %s36_s9 = sshll.u32 %s914_s8, 4  ;;  %p887_p2 = scmp.ne.s32.totalorder %s977_s2, %s886_s12  ;;  %s37_s9 = int_to_ptr.vmem [resolvable:$true] %s36_s9 }
  0x23   :  { %p890_p3 = scmp.lt.u32.totalorder %s886_s12, %s977_s2 }
  0x25   :  { %p892_p4 = pnand %p890_p3, %p887_p2 }
  0x27   :  { %895 = shalt.err (!%p892_p4)
}
  0x28   :  { %s896_s18 = scalar_lea.vmem %s37_s9, 576  ;;  %p901_p6 = scmp.lt.s32.totalorder %s37_s9, %s37_s9 }
  0x29   :  { %p897_p5 = scmp.ne.s32.totalorder %s37_s9, %s896_s18  ;;  %p902_p7 = scmp.lt.s32.totalorder %s896_s18, %s896_s18 }
  0x2b   :  { %p903_p8 = por %p902_p7, %p901_p6 }
  0x2d   :  { %p904_p9 = pnand %p903_p8, %p897_p5 }
  0x2f   :  { %907 = shalt.err (!%p904_p9)
}
  0x30   :  { %39 = dma.hbm_to_vmem [thread:$0]  %s977_s2, 576, %s37_s9, [#allocation5]  }
  0x31   :  { %908 = dma.done.wait [#allocation3], 768  }
  0x32   :  { %909 = vsyncadd [#allocation3], 4294966528 }
  0x33   :  { %910 = dma.done.wait [#allocation5], 1344  }
  0x34   :  { %911 = vsyncadd [#allocation5], 4294965952  ;;  %v71_v0 = vlaneseq  ;;  %v915_v1 = vmov 1983009808   ;;  %v63_v6 = vld [vmem:[#allocation6 + $0xc] sm:$0xff]  ;;  %v61_v7 = vld [vmem:[#allocation6] sm:$0xff] }
  0x35   :  { %v69_v2 = vunpack.c.l.s4 %v915_v1  ;;  %v67_v8 = vcombine.high %v63_v6, %v63_v6  ;;  %v310_v10 = vcombine.high %v61_v7, %v61_v7  ;;  %v56_v11 = vld [vmem:[#allocation4 + $0x8] sm:$0xff]  ;;  %v818_v15 = vld.sshfl [vmem:[#allocation6 + $0x8] sm:$0x33 pattern:$0x76325410]  ;;  %v55_v23 = vld [vmem:[#allocation4] sm:$0xff] }
  0x36   :  { %v72_v3 = vshrl.u32 %v71_v0, 7  ;;  %162 = vmatprep.mubr.f32.mxu1 %v56_v11  ;;  %v52_v12 = vld [vmem:[#allocation2 + $0x18] sm:$0xff]  ;;  %v334_v19 = vcombine.high %v818_v15, %v818_v15  ;;  %v817_v22 = vld.sshfl [vmem:[#allocation6 + $0x14] sm:$0x33 pattern:$0x76325410] }
  0x37   :  { %v70_v4 = vunpack.c.0.s8 %v69_v2  ;;  %475 = vmatprep.mubr.f32.mxu0 %v52_v12  ;;  %v563_v17 = vld [vmem:[#allocation6 + $0x18] sm:$0xff]  ;;  %v58_v24 = vld [vmem:[#allocation4 + $0x18] sm:$0xff]  ;;  %v91_v25 = vcombine.high %v817_v22, %v817_v22  ;;  %v51_v26 = vld [vmem:[#allocation2 + $0x10] sm:$0xff]  ;;  %vm809_vm0 = vcmask 15360  }
  0x38   :  { %v50_v27 = vld [vmem:[#allocation2 + $0x8] sm:$0xff]  ;;  %v567_v30 = vcombine.high %v563_v17, %v563_v17  ;;  %v57_v34 = vld [vmem:[#allocation4 + $0x10] sm:$0xff]  ;;  %v60_v35 = vld [vmem:[#allocation4 + $0x28] sm:$0xff]  ;;  %v554_v42 = vsub.f32 %v52_v12, %v58_v24 }
  0x39   :  { %v73_v5 = vsub.s32 %v70_v4, %v72_v3  ;;  %v54_v28 = vld [vmem:[#allocation2 + $0x28] sm:$0xff]  ;;  %v552_v32 = vsub.f32 %v50_v27, %v56_v11  ;;  %v49_v38 = vld [vmem:[#allocation2] sm:$0xff]  ;;  %v59_v43 = vld [vmem:[#allocation4 + $0x20] sm:$0xff]  ;;  %v553_v48 = vsub.f32 %v51_v26, %v57_v34 }
  0x3a   :  { %v53_v39 = vld [vmem:[#allocation2 + $0x20] sm:$0xff]  ;;  %v551_v41 = vsub.f32 %v49_v38, %v55_v23  ;;  %v560_v46 = vand.u32 2147483647, %v554_v42  ;;  %v556_v49 = vsub.f32 %v54_v28, %v60_v35 }
  0x3b   :  { %v74_v9 = vrot.slane %v63_v6, %v73_v5  ;;  %v324_v14 = vrot.slane %v310_v10, %v73_v5  ;;  %v81_v16 = vrot.slane %v67_v8, %v73_v5  ;;  %v574_v21 = vrot.slane %v563_v17, %v73_v5  ;;  %v819_v44 = vld.sshfl [vmem:[#allocation6 + $0x20] sm:$0x33 pattern:$0x76325410] }
  0x3c   :  { %v317_v31 = vrot.slane %v61_v7, %v73_v5  ;;  %v581_v33 = vrot.slane %v567_v30, %v73_v5  ;;  %v558_v37 = vand.u32 2147483647, %v552_v32  ;;  %v557_v45 = vand.u32 2147483647, %v551_v41 }
  0x3d   :  { %v82_v13 = vcombine.high %v74_v9, %v74_v9  ;;  %v326_v18 = vcombine.high %v324_v14, %v324_v14  ;;  %v83_v20 = vcombine.high %v81_v16, %v81_v16  ;;  %v582_v29 = vcombine.high %v574_v21, %v574_v21 }
  0x3e   :  { %v325_v36 = vcombine.high %v317_v31, %v317_v31  ;;  %v583_v40 = vcombine.high %v581_v33, %v581_v33  ;;  %v591_v47 = vcombine.high %v819_v44, %v819_v44  ;;  %v559_v50 = vand.u32 2147483647, %v553_v48 }
  0x3f   :  { %98 = vmatprep.subr.mxu1 %v82_v13  ;;  %411 = vmatprep.subr.mxu0 %v326_v18  ;;  %v562_v51 = vand.u32 2147483647, %v556_v49  ;;  %v555_v52 = vsub.f32 %v53_v39, %v59_v43 }
  0x40   :  { %99 = vmatpush1.xpose.msra.mxu1 %v74_v9  ;;  %412 = vmatpush1.xpose.msra.mxu0 %v324_v14 }
  0x41   :  { %168 = vmatprep.subr.mxu1 %v83_v20  ;;  %481 = vmatprep.subr.mxu0 %v334_v19  ;;  %v561_v53 = vand.u32 2147483647, %v555_v52 }
  0x43   :  { %163 = vmatmul.mubr.f32.vlgmr.msra.gmra.mrb[0].mxu1 %v55_v23  ;;  %476 = vmatmul.mubr.f32.vlgmr.msra.gmra.mrb[0].mxu0 %v51_v26 }
  0x44   :  { %169 = vmatpush1.xpose.msra.mxu1 %v81_v16  ;;  %232 = vmatprep.mubr.f32.mxu1 %v58_v24 }
  0x45   :  { %238 = vmatprep.subr.mxu1 %v91_v25  ;;  %482 = vmatpush1.xpose.msra.mxu0 %v818_v15 }
  0x46   :  { %545 = vmatprep.mubr.f32.mxu0 %v54_v28  ;;  %598 = vmatprep.subr.mxu0 %v582_v29 }
  0x4b   :  { %233 = vmatmul.mubr.f32.vlgmr.msra.gmra.mrb[0].mxu1 %v57_v34  ;;  %546 = vmatmul.mubr.f32.vlgmr.msra.gmra.mrb[0].mxu0 %v53_v39 }
  0x4c   :  { %239 = vmatpush1.xpose.msra.mxu1 %v817_v22  ;;  %302 = vmatprep.mubr.f32.mxu1 %v60_v35 }
  0x4d   :  { %341 = vmatprep.subr.mxu1 %v325_v36  ;;  %599 = vmatpush1.xpose.msra.mxu0 %v574_v21 }
  0x4e   :  { %662 = vmatprep.mubr.f32.mxu0 %v558_v37  ;;  %668 = vmatprep.subr.mxu0 %v583_v40 }
  0x53   :  { %303 = vmatmul.mubr.f32.vlgmr.msra.gmra.mrb[0].mxu1 %v59_v43  ;;  %663 = vmatmul.mubr.f32.vlgmr.msra.gmra.mrb[0].mxu0 %v557_v45 }
  0x54   :  { %342 = vmatpush1.xpose.msra.mxu1 %v317_v31  ;;  %405 = vmatprep.mubr.f32.mxu1 %v50_v27 }
  0x55   :  { %669 = vmatpush1.xpose.msra.mxu0 %v581_v33  ;;  %732 = vmatprep.mubr.f32.mxu0 %v560_v46 }
  0x56   :  { %738 = vmatprep.subr.mxu0 %v591_v47 }
  0x5b   :  { %406 = vmatmul.mubr.f32.vlgmr.msra.gmra.mrb[0].mxu1 %v49_v38  ;;  %733 = vmatmul.mubr.f32.vlgmr.msra.gmra.mrb[0].mxu0 %v559_v50 }
  0x5c   :  { %739 = vmatpush1.xpose.msra.mxu0 %v819_v44  ;;  %802 = vmatprep.mubr.f32.mxu0 %v562_v51 }
  0x63   :  { %803 = vmatmul.mubr.f32.vlgmr.msra.gmra.mrb[0].mxu0 %v561_v53 }
 0x12e   :  { %v407_v54 = vpop.f32.mrb[0].mxu1 }
 0x12f   :  { %v409_v55 = vpop.f32.mrb[1].mxu1 }
 0x136   :  { %v804_v56 = vpop.f32.mrb[0].mxu0 }
 0x137   :  { %v820_v57 = vadd.f32 %v804_v56, %v407_v54  ;;  %v806_v58 = vpop.f32.mrb[1].mxu0 }
 0x139   :  { %810 = vst.msk [vmem:[%s978_s3] sm:$0xff] %vm809_vm0, %v820_v57 }
 0x13a   :  { %815 = vsyncpa [#allocation3], 1 }
 0x13b   :  { %816 = vsyncpa [#allocation5], 1 }

</bundles_post_ra>
